<compile_context>
chip_gen: v5e
topology: v5e:2x2
jax: 0.10.0
libtpu: 0.0.40
codegen_flags: <defaults>
</compile_context>

<pallas_src>
import math

import jax
import jax.numpy as jnp
from jax.experimental import pallas as pl
from jax.experimental.pallas import tpu as pltpu

# Module hyper-parameters (from WeightedDiceBCE.__init__)
DICE_W = 1.0               # dice_weight
BCE_W = 1.0                # BCE_weight
DICE_WEIGHTS = (0.5, 0.5)  # WeightedDiceLoss weights -> constant w = 0.5 (folded)
BCE_WEIGHTS = (0.5, 0.5)   # WeightedBCE weights
SMOOTH = 1e-5
EPS = 1e-12
LOG_CLAMP = -100.0         # F.binary_cross_entropy clamps log terms at -100
LANE = 128


def _cdiv(a, b):
    return (a + b - 1) // b


def _v7_tensorcores():
    """2 only on v7-kind devices (2 TCs/chip); 1 on v5e/v6e and unknown parts."""
    try:
        kind = jax.devices()[0].device_kind.lower()
    except Exception:
        return 1
    return 2 if "v7" in kind else 1


def _vmem_capacity_bytes():
    try:
        cap = getattr(pltpu.get_tpu_info(), "vmem_capacity_bytes", None)
        if cap:
            return int(cap)
    except Exception:
        pass
    return 128 << 20


def _make_stats_kernel(clip_targets):
    def kernel(p_ref, t_ref, out_ref):
        """Accumulate per-(batch, sublane, lane) partial statistics.

        p_ref/t_ref: (tb, ts8, 8, 128) tile of probabilities / targets (native dtype).
        out_ref:     (1, 6, tb, 8, 128) resident f32 stats block:
                     [0]=sum(p*t) [1]=sum(p*p) [2]=sum(t*t)
                     [3]=sum(pos) [4]=sum(pos*raw) [5]=sum(raw)   (raw = -bce)
        """
        k = pl.program_id(2)

        @pl.when(k == 0)
        def _():
            out_ref[...] = jnp.zeros_like(out_ref)

        p = p_ref[...].astype(jnp.float32)               # (tb, ts8, 8, 128)
        t = t_ref[...].astype(jnp.float32)
        if clip_targets:                                  # module clamps targets to [0, 1]
            t = jnp.clip(t, 0.0, 1.0)

        # ---- Dice raw sums (constant w = 0.5 is applied at finalize) ----
        out_ref[0, 0] += jnp.sum(p * t, axis=1)           # (tb, 8, 128)
        out_ref[0, 1] += jnp.sum(p * p, axis=1)
        out_ref[0, 2] += jnp.sum(t * t, axis=1)

        # ---- BCE partial sums.  raw = t*log(p) + (1-t)*log(1-p) = -bce; the negate
        #      happens at finalize.  The clamps MUST stay inside so zero padding
        #      yields 0 * (-100) = 0 rather than 0 * (-inf) = NaN.
        log_p = jnp.maximum(jnp.log(p), LOG_CLAMP)
        log_1mp = jnp.maximum(jnp.log(1.0 - p), LOG_CLAMP)
        raw = t * (log_p - log_1mp) + log_1mp
        is_pos = t > 0.5
        out_ref[0, 3] += jnp.sum(
            jnp.where(is_pos, jnp.float32(1.0), jnp.float32(0.0)), axis=1)
        out_ref[0, 4] += jnp.sum(
            jnp.where(is_pos, raw, jnp.float32(0.0)), axis=1)
        out_ref[0, 5] += jnp.sum(raw, axis=1)

    return kernel


def weighted_dice_bce(inputs, targets, *, clip_targets=True):
    """inputs/targets: (B, ...) arrays; inputs are probabilities in (0, 1).

    Set clip_targets=False only if targets are already guaranteed in [0, 1]
    (saves ~2 VALU ops/element on compute-bound configs).
    """
    B = inputs.shape[0]
    N = math.prod(inputs.shape[1:])
    p = inputs.reshape(B, N)
    t = targets.reshape(B, N)

    itemsize = max(p.dtype.itemsize, t.dtype.itemsize)
    per_input_budget = 4 << 20                      # ~4 MiB per input block

    # ---- Batch tile: keep full B unless even a minimal (ts=8) block blows the budget.
    min_row_bytes = 8 * LANE * itemsize
    tb = B
    if B * min_row_bytes > per_input_budget:
        tb = min(B, max(1, per_input_budget // min_row_bytes))
    b_blocks = _cdiv(B, tb)
    b_pad = b_blocks * tb

    # ---- Row tile: lane-dense (tb, ts/8, 8, 128) blocks, ~4 MiB per input block.
    rows = _cdiv(N, LANE)
    ts = per_input_budget // max(tb * LANE * itemsize, 1)
    ts = max(8, min(4096, (ts // 8) * 8))
    rows8 = _cdiv(rows, 8) * 8
    ts = min(ts, rows8)

    num_blocks = _cdiv(rows, ts)

    # ---- Cross-TensorCore split of the reduction (v7x only; 1 on v5e/v6e).
    splits = _v7_tensorcores()
    if num_blocks < splits:
        splits = 1
    steps = _cdiv(num_blocks, splits)
    rows_pad = splits * steps * ts
    n_pad = rows_pad * LANE

    # Zero padding contributes exactly 0 to every statistic (p=0, t=0 -> raw=0,
    # pos=0, dice sums 0); the finalize uses the true element count B*N and only
    # the first B batch rows.
    if n_pad != N or b_pad != B:
        p = jnp.pad(p, ((0, b_pad - B), (0, n_pad - N)))
        t = jnp.pad(t, ((0, b_pad - B), (0, n_pad - N)))
    ts8 = ts // 8
    p4 = p.reshape(b_pad, rows_pad // 8, 8, LANE)
    t4 = t.reshape(b_pad, rows_pad // 8, 8, LANE)

    block_bytes = tb * ts * LANE * (p4.dtype.itemsize + t4.dtype.itemsize)
    vmem_cap = _vmem_capacity_bytes()
    vmem_limit = int(min(max(3 * block_bytes + (4 << 20), 16 << 20),
                         vmem_cap // 2, 48 << 20))

    cost = pl.CostEstimate(
        flops=17 * b_pad * n_pad,
        transcendentals=2 * b_pad * n_pad,
        bytes_accessed=b_pad * n_pad * (p4.dtype.itemsize + t4.dtype.itemsize)
        + splits * 6 * b_pad * 8 * LANE * 4,
    )

    if splits > 1:
        semantics = (pltpu.CORE_PARALLEL, pltpu.ARBITRARY, pltpu.ARBITRARY)
    else:
        semantics = ("arbitrary", "arbitrary", "arbitrary")

    in_map = lambda c, b, k: (b, c * steps + k, 0, 0)
    out_map = lambda c, b, k: (c, 0, b, 0, 0)

    stats = pl.pallas_call(
        _make_stats_kernel(clip_targets),
        out_shape=jax.ShapeDtypeStruct((splits, 6, b_pad, 8, LANE), jnp.float32),
        grid_spec=pltpu.PrefetchScalarGridSpec(
            num_scalar_prefetch=0,
            grid=(splits, b_blocks, steps),
            in_specs=[
                pl.BlockSpec((tb, ts8, 8, LANE), in_map),
                pl.BlockSpec((tb, ts8, 8, LANE), in_map),
            ],
            out_specs=pl.BlockSpec((1, 6, tb, 8, LANE), out_map),
        ),
        compiler_params=pltpu.CompilerParams(
            dimension_semantics=semantics,
            vmem_limit_bytes=vmem_limit,
        ),
        cost_estimate=cost,
    )(p4, t4)

    # ---- Finalize (tiny: splits*6*b_pad*8*128 floats) ----
    s = jnp.sum(stats, axis=(0, 3, 4))[:, :B]       # (6, B): combine splits/sublanes/lanes
    # Dice with constant w = 0.5: wp*wt = 0.25*p*t, wp*wp = 0.25*p*p, wt*wt = 0.25*t*t
    inter = 0.25 * s[0]
    union = 0.25 * (s[1] + s[2])
    dice = jnp.mean(1.0 - (2.0 * inter + SMOOTH) / (union + SMOOTH))
    pos_cnt = jnp.sum(s[3])
    pos_loss = -jnp.sum(s[4])                       # raw = -bce -> negate here
    tot_loss = -jnp.sum(s[5])
    neg_cnt = jnp.float32(B * N) - pos_cnt          # true (unpadded) element count
    neg_loss = tot_loss - pos_loss
    bce = (BCE_WEIGHTS[0] * pos_loss / (pos_cnt + EPS)
           + BCE_WEIGHTS[1] * neg_loss / (neg_cnt + EPS))
    return DICE_W * dice + BCE_W * bce


def _reference(inputs, targets):
    """Plain-JAX reference mirroring the PyTorch module."""
    B = inputs.shape[0]
    p2 = inputs.reshape(B, -1).astype(jnp.float32)
    t2 = jnp.clip(targets.reshape(B, -1).astype(jnp.float32), 0.0, 1.0)
    # dice
    w = t2 * (DICE_WEIGHTS[1] - DICE_WEIGHTS[0]) + DICE_WEIGHTS[0]
    wp, wt = w * p2, w * t2
    inter = jnp.sum(wp * wt, axis=-1)
    union = jnp.sum(wp * wp, axis=-1) + jnp.sum(wt * wt, axis=-1)
    dice = jnp.mean(1.0 - (2.0 * inter + SMOOTH) / (union + SMOOTH))
    # bce
    pf, tf = p2.reshape(-1), t2.reshape(-1)
    bce = -(tf * jnp.maximum(jnp.log(pf), LOG_CLAMP)
            + (1.0 - tf) * jnp.maximum(jnp.log(1.0 - pf), LOG_CLAMP))
    pos = (tf > 0.5).astype(jnp.float32)
    neg = (tf <= 0.5).astype(jnp.float32)
    pos_w = jnp.sum(pos) + EPS
    neg_w = jnp.sum(neg) + EPS
    bce_loss = jnp.sum(BCE_WEIGHTS[0] * pos * bce / pos_w
                       + BCE_WEIGHTS[1] * neg * bce / neg_w)
    return DICE_W * dice + BCE_W * bce_loss


if __name__ == "__main__":
    key = jax.random.PRNGKey(0)
    k1, k2 = jax.random.split(key)
    B, C, H, W = 2, 4, 16, 16
    # inputs are probabilities (post-sigmoid), as required by F.binary_cross_entropy
    inputs = jax.nn.sigmoid(jax.random.normal(k1, (B, C, H, W), jnp.float32))
    targets = (jax.random.uniform(k2, (B, C, H, W), jnp.float32) > 0.5).astype(jnp.float32)

    loss = jax.block_until_ready(weighted_dice_bce(inputs, targets))
    ref = jax.block_until_ready(_reference(inputs, targets))
    assert jnp.allclose(loss, ref, rtol=1e-5, atol=1e-5), (loss, ref)
    print("KERNEL_OK")
</pallas_src>

<mosaic_0001>
module attributes {stable_mosaic.version = 11 : i64} {
  func.func @kernel(%arg0: i32, %arg1: i32, %arg2: i32, %arg3: memref<2x1x8x128xf32, #tpu.memory_space<vmem>>, %arg4: memref<2x1x8x128xf32, #tpu.memory_space<vmem>>, %arg5: memref<1x6x2x8x128xf32, #tpu.memory_space<vmem>>) attributes {dimension_semantics = [#tpu.dimension_semantics<arbitrary>, #tpu.dimension_semantics<arbitrary>, #tpu.dimension_semantics<arbitrary>], iteration_bounds = array<i64: 1, 1, 1>, scalar_prefetch = 0 : i64, scratch_operands = 0 : i64, tpu.core_type = #tpu.core_type<tc>, window_params = [{transform_indices = @transform_0, window_bounds = array<i64: 2, 1, 8, 128>}, {transform_indices = @transform_1, window_bounds = array<i64: 2, 1, 8, 128>}, {transform_indices = @transform_2, window_bounds = array<i64: 1, 6, 2, 8, 128>}]} {
    %c0_i32 = arith.constant 0 : i32
    %0 = arith.cmpi eq, %arg2, %c0_i32 : i32
    %1 = arith.extui %0 : i1 to i32
    %c0_i32_0 = arith.constant 0 : i32
    %2 = arith.cmpi ne, %1, %c0_i32_0 : i32
    scf.if %2 {
      %cst_77 = arith.constant 0.000000e+00 : f32
      %72 = vector.broadcast %cst_77 : f32 to vector<1x6x2x8x128xf32>
      %c0_78 = arith.constant 0 : index
      %c0_79 = arith.constant 0 : index
      %c0_80 = arith.constant 0 : index
      %c0_81 = arith.constant 0 : index
      %c0_82 = arith.constant 0 : index
      %73 = vector.load %arg5[%c0_78, %c0_79, %c0_80, %c0_81, %c0_82] : memref<1x6x2x8x128xf32, #tpu.memory_space<vmem>>, vector<1x6x2x8x128xf32>
      tpu.vector_store %arg5[%c0_78, %c0_79, %c0_80, %c0_81, %c0_82], %72 {strides = array<i32>} : memref<1x6x2x8x128xf32, #tpu.memory_space<vmem>>, vector<1x6x2x8x128xf32>,
    } else {
    }
    %c0 = arith.constant 0 : index
    %c0_1 = arith.constant 0 : index
    %c0_2 = arith.constant 0 : index
    %c0_3 = arith.constant 0 : index
    %3 = vector.load %arg3[%c0, %c0_1, %c0_2, %c0_3] : memref<2x1x8x128xf32, #tpu.memory_space<vmem>>, vector<2x1x8x128xf32>
    %c0_4 = arith.constant 0 : index
    %c0_5 = arith.constant 0 : index
    %c0_6 = arith.constant 0 : index
    %c0_7 = arith.constant 0 : index
    %4 = vector.load %arg4[%c0_4, %c0_5, %c0_6, %c0_7] : memref<2x1x8x128xf32, #tpu.memory_space<vmem>>, vector<2x1x8x128xf32>
    %cst = arith.constant 0.000000e+00 : f32
    %cst_8 = arith.constant 1.000000e+00 : f32
    %5 = vector.broadcast %cst : f32 to vector<2x1x8x128xf32>
    %6 = arith.maximumf %5, %4 : vector<2x1x8x128xf32>
    %7 = vector.broadcast %cst_8 : f32 to vector<2x1x8x128xf32>
    %8 = arith.minimumf %7, %6 : vector<2x1x8x128xf32>
    %c0_9 = arith.constant 0 : index
    %c0_10 = arith.constant 0 : index
    %c0_11 = arith.constant 0 : index
    %c0_12 = arith.constant 0 : index
    %c0_13 = arith.constant 0 : index
    %9 = vector.load %arg5[%c0_9, %c0_10, %c0_11, %c0_12, %c0_13] : memref<1x6x2x8x128xf32, #tpu.memory_space<vmem>>, vector<1x1x2x8x128xf32>
    %10 = vector.shape_cast %9 : vector<1x1x2x8x128xf32> to vector<2x8x128xf32>
    %11 = arith.mulf %3, %8 : vector<2x1x8x128xf32>
    %cst_14 = arith.constant dense<0.000000e+00> : vector<2x8x128xf32>
    %12 = vector.multi_reduction <add>, %11, %cst_14 [1] : vector<2x1x8x128xf32> to vector<2x8x128xf32>
    %13 = arith.addf %10, %12 : vector<2x8x128xf32>
    %c0_15 = arith.constant 0 : index
    %c0_16 = arith.constant 0 : index
    %c0_17 = arith.constant 0 : index
    %c0_18 = arith.constant 0 : index
    %c0_19 = arith.constant 0 : index
    %14 = vector.load %arg5[%c0_15, %c0_16, %c0_17, %c0_18, %c0_19] : memref<1x6x2x8x128xf32, #tpu.memory_space<vmem>>, vector<1x1x2x8x128xf32>
    %15 = vector.shape_cast %14 : vector<1x1x2x8x128xf32> to vector<2x8x128xf32>
    %16 = vector.shape_cast %13 : vector<2x8x128xf32> to vector<1x1x2x8x128xf32>
    tpu.vector_store %arg5[%c0_15, %c0_16, %c0_17, %c0_18, %c0_19], %16 {strides = array<i32>} : memref<1x6x2x8x128xf32, #tpu.memory_space<vmem>>, vector<1x1x2x8x128xf32>,
    %c0_20 = arith.constant 0 : index
    %c1 = arith.constant 1 : index
    %c0_21 = arith.constant 0 : index
    %c0_22 = arith.constant 0 : index
    %c0_23 = arith.constant 0 : index
    %17 = vector.load %arg5[%c0_20, %c1, %c0_21, %c0_22, %c0_23] : memref<1x6x2x8x128xf32, #tpu.memory_space<vmem>>, vector<1x1x2x8x128xf32>
    %18 = vector.shape_cast %17 : vector<1x1x2x8x128xf32> to vector<2x8x128xf32>
    %19 = arith.mulf %3, %3 : vector<2x1x8x128xf32>
    %cst_24 = arith.constant dense<0.000000e+00> : vector<2x8x128xf32>
    %20 = vector.multi_reduction <add>, %19, %cst_24 [1] : vector<2x1x8x128xf32> to vector<2x8x128xf32>
    %21 = arith.addf %18, %20 : vector<2x8x128xf32>
    %c0_25 = arith.constant 0 : index
    %c1_26 = arith.constant 1 : index
    %c0_27 = arith.constant 0 : index
    %c0_28 = arith.constant 0 : index
    %c0_29 = arith.constant 0 : index
    %22 = vector.load %arg5[%c0_25, %c1_26, %c0_27, %c0_28, %c0_29] : memref<1x6x2x8x128xf32, #tpu.memory_space<vmem>>, vector<1x1x2x8x128xf32>
    %23 = vector.shape_cast %22 : vector<1x1x2x8x128xf32> to vector<2x8x128xf32>
    %24 = vector.shape_cast %21 : vector<2x8x128xf32> to vector<1x1x2x8x128xf32>
    tpu.vector_store %arg5[%c0_25, %c1_26, %c0_27, %c0_28, %c0_29], %24 {strides = array<i32>} : memref<1x6x2x8x128xf32, #tpu.memory_space<vmem>>, vector<1x1x2x8x128xf32>,
    %c0_30 = arith.constant 0 : index
    %c2 = arith.constant 2 : index
    %c0_31 = arith.constant 0 : index
    %c0_32 = arith.constant 0 : index
    %c0_33 = arith.constant 0 : index
    %25 = vector.load %arg5[%c0_30, %c2, %c0_31, %c0_32, %c0_33] : memref<1x6x2x8x128xf32, #tpu.memory_space<vmem>>, vector<1x1x2x8x128xf32>
    %26 = vector.shape_cast %25 : vector<1x1x2x8x128xf32> to vector<2x8x128xf32>
    %27 = arith.mulf %8, %8 : vector<2x1x8x128xf32>
    %cst_34 = arith.constant dense<0.000000e+00> : vector<2x8x128xf32>
    %28 = vector.multi_reduction <add>, %27, %cst_34 [1] : vector<2x1x8x128xf32> to vector<2x8x128xf32>
    %29 = arith.addf %26, %28 : vector<2x8x128xf32>
    %c0_35 = arith.constant 0 : index
    %c2_36 = arith.constant 2 : index
    %c0_37 = arith.constant 0 : index
    %c0_38 = arith.constant 0 : index
    %c0_39 = arith.constant 0 : index
    %30 = vector.load %arg5[%c0_35, %c2_36, %c0_37, %c0_38, %c0_39] : memref<1x6x2x8x128xf32, #tpu.memory_space<vmem>>, vector<1x1x2x8x128xf32>
    %31 = vector.shape_cast %30 : vector<1x1x2x8x128xf32> to vector<2x8x128xf32>
    %32 = vector.shape_cast %29 : vector<2x8x128xf32> to vector<1x1x2x8x128xf32>
    tpu.vector_store %arg5[%c0_35, %c2_36, %c0_37, %c0_38, %c0_39], %32 {strides = array<i32>} : memref<1x6x2x8x128xf32, #tpu.memory_space<vmem>>, vector<1x1x2x8x128xf32>,
    %33 = math.log %3 : vector<2x1x8x128xf32>
    %cst_40 = arith.constant -1.000000e+02 : f32
    %34 = vector.broadcast %cst_40 : f32 to vector<2x1x8x128xf32>
    %35 = arith.maximumf %33, %34 : vector<2x1x8x128xf32>
    %cst_41 = arith.constant 1.000000e+00 : f32
    %36 = vector.broadcast %cst_41 : f32 to vector<2x1x8x128xf32>
    %37 = arith.subf %36, %3 : vector<2x1x8x128xf32>
    %38 = math.log %37 : vector<2x1x8x128xf32>
    %cst_42 = arith.constant -1.000000e+02 : f32
    %39 = vector.broadcast %cst_42 : f32 to vector<2x1x8x128xf32>
    %40 = arith.maximumf %38, %39 : vector<2x1x8x128xf32>
    %41 = arith.subf %35, %40 : vector<2x1x8x128xf32>
    %42 = arith.mulf %8, %41 : vector<2x1x8x128xf32>
    %43 = arith.addf %42, %40 : vector<2x1x8x128xf32>
    %cst_43 = arith.constant 5.000000e-01 : f32
    %44 = vector.broadcast %cst_43 : f32 to vector<2x1x8x128xf32>
    %45 = arith.cmpf ogt, %8, %44 : vector<2x1x8x128xf32>
    %c0_44 = arith.constant 0 : index
    %c3 = arith.constant 3 : index
    %c0_45 = arith.constant 0 : index
    %c0_46 = arith.constant 0 : index
    %c0_47 = arith.constant 0 : index
    %46 = vector.load %arg5[%c0_44, %c3, %c0_45, %c0_46, %c0_47] : memref<1x6x2x8x128xf32, #tpu.memory_space<vmem>>, vector<1x1x2x8x128xf32>
    %47 = vector.shape_cast %46 : vector<1x1x2x8x128xf32> to vector<2x8x128xf32>
    %cst_48 = arith.constant 1.000000e+00 : f32
    %cst_49 = arith.constant 0.000000e+00 : f32
    %48 = vector.broadcast %cst_48 : f32 to vector<2x1x8x128xf32>
    %49 = vector.broadcast %cst_49 : f32 to vector<2x1x8x128xf32>
    %50 = arith.select %45, %48, %49 : vector<2x1x8x128xi1>, vector<2x1x8x128xf32>
    %cst_50 = arith.constant dense<0.000000e+00> : vector<2x8x128xf32>
    %51 = vector.multi_reduction <add>, %50, %cst_50 [1] : vector<2x1x8x128xf32> to vector<2x8x128xf32>
    %52 = arith.addf %47, %51 : vector<2x8x128xf32>
    %c0_51 = arith.constant 0 : index
    %c3_52 = arith.constant 3 : index
    %c0_53 = arith.constant 0 : index
    %c0_54 = arith.constant 0 : index
    %c0_55 = arith.constant 0 : index
    %53 = vector.load %arg5[%c0_51, %c3_52, %c0_53, %c0_54, %c0_55] : memref<1x6x2x8x128xf32, #tpu.memory_space<vmem>>, vector<1x1x2x8x128xf32>
    %54 = vector.shape_cast %53 : vector<1x1x2x8x128xf32> to vector<2x8x128xf32>
    %55 = vector.shape_cast %52 : vector<2x8x128xf32> to vector<1x1x2x8x128xf32>
    tpu.vector_store %arg5[%c0_51, %c3_52, %c0_53, %c0_54, %c0_55], %55 {strides = array<i32>} : memref<1x6x2x8x128xf32, #tpu.memory_space<vmem>>, vector<1x1x2x8x128xf32>,
    %c0_56 = arith.constant 0 : index
    %c4 = arith.constant 4 : index
    %c0_57 = arith.constant 0 : index
    %c0_58 = arith.constant 0 : index
    %c0_59 = arith.constant 0 : index
    %56 = vector.load %arg5[%c0_56, %c4, %c0_57, %c0_58, %c0_59] : memref<1x6x2x8x128xf32, #tpu.memory_space<vmem>>, vector<1x1x2x8x128xf32>
    %57 = vector.shape_cast %56 : vector<1x1x2x8x128xf32> to vector<2x8x128xf32>
    %cst_60 = arith.constant 0.000000e+00 : f32
    %58 = vector.broadcast %cst_60 : f32 to vector<2x1x8x128xf32>
    %59 = arith.select %45, %43, %58 : vector<2x1x8x128xi1>, vector<2x1x8x128xf32>
    %cst_61 = arith.constant dense<0.000000e+00> : vector<2x8x128xf32>
    %60 = vector.multi_reduction <add>, %59, %cst_61 [1] : vector<2x1x8x128xf32> to vector<2x8x128xf32>
    %61 = arith.addf %57, %60 : vector<2x8x128xf32>
    %c0_62 = arith.constant 0 : index
    %c4_63 = arith.constant 4 : index
    %c0_64 = arith.constant 0 : index
    %c0_65 = arith.constant 0 : index
    %c0_66 = arith.constant 0 : index
    %62 = vector.load %arg5[%c0_62, %c4_63, %c0_64, %c0_65, %c0_66] : memref<1x6x2x8x128xf32, #tpu.memory_space<vmem>>, vector<1x1x2x8x128xf32>
    %63 = vector.shape_cast %62 : vector<1x1x2x8x128xf32> to vector<2x8x128xf32>
    %64 = vector.shape_cast %61 : vector<2x8x128xf32> to vector<1x1x2x8x128xf32>
    tpu.vector_store %arg5[%c0_62, %c4_63, %c0_64, %c0_65, %c0_66], %64 {strides = array<i32>} : memref<1x6x2x8x128xf32, #tpu.memory_space<vmem>>, vector<1x1x2x8x128xf32>,
    %c0_67 = arith.constant 0 : index
    %c5 = arith.constant 5 : index
    %c0_68 = arith.constant 0 : index
    %c0_69 = arith.constant 0 : index
    %c0_70 = arith.constant 0 : index
    %65 = vector.load %arg5[%c0_67, %c5, %c0_68, %c0_69, %c0_70] : memref<1x6x2x8x128xf32, #tpu.memory_space<vmem>>, vector<1x1x2x8x128xf32>
    %66 = vector.shape_cast %65 : vector<1x1x2x8x128xf32> to vector<2x8x128xf32>
    %cst_71 = arith.constant dense<0.000000e+00> : vector<2x8x128xf32>
    %67 = vector.multi_reduction <add>, %43, %cst_71 [1] : vector<2x1x8x128xf32> to vector<2x8x128xf32>
    %68 = arith.addf %66, %67 : vector<2x8x128xf32>
    %c0_72 = arith.constant 0 : index
    %c5_73 = arith.constant 5 : index
    %c0_74 = arith.constant 0 : index
    %c0_75 = arith.constant 0 : index
    %c0_76 = arith.constant 0 : index
    %69 = vector.load %arg5[%c0_72, %c5_73, %c0_74, %c0_75, %c0_76] : memref<1x6x2x8x128xf32, #tpu.memory_space<vmem>>, vector<1x1x2x8x128xf32>
    %70 = vector.shape_cast %69 : vector<1x1x2x8x128xf32> to vector<2x8x128xf32>
    %71 = vector.shape_cast %68 : vector<2x8x128xf32> to vector<1x1x2x8x128xf32>
    tpu.vector_store %arg5[%c0_72, %c5_73, %c0_74, %c0_75, %c0_76], %71 {strides = array<i32>} : memref<1x6x2x8x128xf32, #tpu.memory_space<vmem>>, vector<1x1x2x8x128xf32>,
    return
  }
  func.func @transform_0(%arg0: i32, %arg1: i32, %arg2: i32) -> (i32, i32, i32, i32) {
    %c1_i32 = arith.constant 1 : i32
    %0 = arith.muli %arg0, %c1_i32 : i32
    %1 = arith.addi %0, %arg2 : i32
    %c0_i32 = arith.constant 0 : i32
    %c0_i32_0 = arith.constant 0 : i32
    %c0_i32_1 = arith.constant 0 : i32
    return %arg1, %1, %c0_i32, %c0_i32_0 : i32, i32, i32, i32
  }
  func.func @transform_1(%arg0: i32, %arg1: i32, %arg2: i32) -> (i32, i32, i32, i32) {
    %c1_i32 = arith.constant 1 : i32
    %0 = arith.muli %arg0, %c1_i32 : i32
    %1 = arith.addi %0, %arg2 : i32
    %c0_i32 = arith.constant 0 : i32
    %c0_i32_0 = arith.constant 0 : i32
    %c0_i32_1 = arith.constant 0 : i32
    return %arg1, %1, %c0_i32, %c0_i32_0 : i32, i32, i32, i32
  }
  func.func @transform_2(%arg0: i32, %arg1: i32, %arg2: i32) -> (i32, i32, i32, i32, i32) {
    %c0_i32 = arith.constant 0 : i32
    %c0_i32_0 = arith.constant 0 : i32
    %c0_i32_1 = arith.constant 0 : i32
    %c0_i32_2 = arith.constant 0 : i32
    return %arg0, %c0_i32, %arg1, %c0_i32_0, %c0_i32_1 : i32, i32, i32, i32, i32
  }
}

</mosaic_0001>

<bundles_post_ra>
// kernel: tpu_custom_call.1
= control target key start
LH: loop header
LB: loop body
LE: loop exit
PB: predicated region body
PF: predicated region fallthrough
CT: control target
= control target key end

     0   :  { %7 = vsyncpa [#allocation3], 0  ;;  %s316_s0 = inlined_call_operand.hbm [shape: f32[2,1,8,128], index: 0, kind: input, shape index: {}]   ;;  %s317_s1 = inlined_call_operand.hbm [shape: f32[2,1,8,128], index: 1, kind: input, shape index: {}]   ;;  %s318_s2 = inlined_call_operand.hbm [shape: f32[1,6,2,8,128], index: 2, kind: output, shape index: {}]  }
   0x1   :  { %8 = vsyncpa [#allocation6], 0 }
   0x2   :  { %9 = vsyncpa [#allocation4], 0  ;;  %s17_s11 = sshll.u32 %s316_s0, 4  ;;  %s273_s12 = smov [#allocation2]   ;;  %s18_s11 = int_to_ptr.hbm [resolvable:$true] %s17_s11 }
   0x3   :  { %s19_s13 = sshll.u32 %s273_s12, 4  ;;  %s33_s16 = sshll.u32 %s317_s1, 4  ;;  %s20_s13 = int_to_ptr.vmem [resolvable:$true] %s19_s13  ;;  %s34_s16 = int_to_ptr.hbm [resolvable:$true] %s33_s16 }
   0x4   :  { %s274_s17 = smov 128   ;;  %s275_s18 = smov 8  }
   0x5   :  { %25 = dma.hbm_to_vmem [thread:$0]  %s18_s11, 256, %s20_s13, [#allocation3], %s274_s17, %s274_s17, %s275_s18  }
   0x6   :  { %s276_s19 = smov [#allocation5]  }
   0x7   :  { %s35_s20 = sshll.u32 %s276_s19, 4  ;;  %s36_s20 = int_to_ptr.vmem [resolvable:$true] %s35_s20 }
   0x8   :  { %41 = dma.hbm_to_vmem [thread:$0]  %s34_s16, 256, %s36_s20, [#allocation6], %s274_s17, %s274_s17, %s275_s18  }
   0x9   :  { %267 = dma.done.wait [#allocation3], 256  }
   0xa   :  { %268 = vsyncadd [#allocation3], 4294967040 }
   0xb   :  { %269 = dma.done.wait [#allocation6], 256  }
   0xc   :  { %270 = vsyncadd [#allocation6], 4294967040  ;;  %v68_v0 = vld [vmem:[#allocation2] sm:$0xff]  ;;  %v70_v1 = vld [vmem:[#allocation5] sm:$0xff]  ;;  %v277_v16 = vmov 0.0   ;;  %s278_s0 = smov [#allocation7]  }
   0xd   :  { %v69_v2 = vld [vmem:[#allocation2 + $0x8] sm:$0xff]  ;;  %v72_v3 = vmax.f32 %v70_v1, 0.0  ;;  %187 = vlog2.f32 %v68_v0  ;;  %v71_v4 = vld [vmem:[#allocation5 + $0x8] sm:$0xff]  ;;  %v89_v5 = vmul.f32 %v68_v0, %v68_v0  ;;  %v114_v8 = vsub.f32 1.0, %v68_v0  ;;  %s165_s1 = sshll.u32 %s278_s0, 4  ;;  %s167_s23 = sshll.u32 %s318_s2, 4  ;;  %s166_s1 = int_to_ptr.vmem [resolvable:$true] %s165_s1  ;;  %s168_s23 = int_to_ptr.hbm [resolvable:$true] %s167_s23 }
   0xe   :  { %v90_v6 = vmul.f32 %v69_v2, %v69_v2  ;;  %v73_v7 = vmax.f32 %v71_v4, 0.0  ;;  %189 = vlog2.f32 %v69_v2  ;;  %v115_v9 = vsub.f32 1.0, %v69_v2 }
   0xf   :  { %v74_v10 = vmin.f32 %v72_v3, 1.0  ;;  %191 = vlog2.f32 %v114_v8  ;;  %95 = vst [vmem:[#allocation7 + $0x10] sm:$0xff] %v89_v5 }
  0x10   :  { %v75_v11 = vmin.f32 %v73_v7, 1.0  ;;  %193 = vlog2.f32 %v115_v9  ;;  %96 = vst [vmem:[#allocation7 + $0x18] sm:$0xff] %v90_v6 }
  0x11   :  { %v78_v12 = vmul.f32 %v74_v10, %v68_v0  ;;  %v100_v13 = vmul.f32 %v74_v10, %v74_v10  ;;  %vm128_vm0 = vcmp.gt.f32.partialorder %v74_v10, 0.5 }
  0x12   :  { %v79_v14 = vmul.f32 %v75_v11, %v69_v2  ;;  %v101_v15 = vmul.f32 %v75_v11, %v75_v11  ;;  %v133_v17 = vsel %vm128_vm0, 1.0, %v277_v16  ;;  %vm129_vm1 = vcmp.gt.f32.partialorder %v75_v11, 0.5 }
  0x13   :  { %v188_v18 = vpop.eup %187  ;;  %v134_v19 = vsel %vm129_vm1, 1.0, %v277_v16  ;;  %84 = vst [vmem:[#allocation7] sm:$0xff] %v78_v12 }
  0x14   :  { %v190_v20 = vpop.eup %189  ;;  %v109_v21 = vmul.f32 0.6931472, %v188_v18  ;;  %85 = vst [vmem:[#allocation7 + $0x8] sm:$0xff] %v79_v14 }
  0x15   :  { %v111_v22 = vmul.f32 0.6931472, %v190_v20  ;;  %v192_v23 = vpop.eup %191  ;;  %106 = vst [vmem:[#allocation7 + $0x20] sm:$0xff] %v100_v13 }
  0x16   :  { %v194_v24 = vpop.eup %193  ;;  %v112_v25 = vmax.f32 %v109_v21, -100.0  ;;  %v117_v26 = vmul.f32 0.6931472, %v192_v23  ;;  %107 = vst [vmem:[#allocation7 + $0x28] sm:$0xff] %v101_v15 }
  0x17   :  { %v113_v27 = vmax.f32 %v111_v22, -100.0  ;;  %v119_v28 = vmul.f32 0.6931472, %v194_v24  ;;  %139 = vst [vmem:[#allocation7 + $0x30] sm:$0xff] %v133_v17 }
  0x18   :  { %v120_v29 = vmax.f32 %v117_v26, -100.0  ;;  %140 = vst [vmem:[#allocation7 + $0x38] sm:$0xff] %v134_v19 }
  0x19   :  { %v121_v30 = vmax.f32 %v119_v28, -100.0 }
  0x1a   :  { %v122_v31 = vsub.f32 %v112_v25, %v120_v29 }
  0x1b   :  { %v123_v32 = vsub.f32 %v113_v27, %v121_v30 }
  0x1c   :  { %v124_v33 = vmul.f32 %v122_v31, %v74_v10 }
  0x1d   :  { %v125_v34 = vmul.f32 %v123_v32, %v75_v11 }
  0x1e   :  { %v126_v35 = vadd.f32 %v124_v33, %v120_v29 }
  0x1f   :  { %v127_v36 = vadd.f32 %v125_v34, %v121_v30 }
  0x20   :  { %v144_v37 = vsel %vm128_vm0, %v126_v35, 0.0  ;;  %159 = vst [vmem:[#allocation7 + $0x50] sm:$0xff] %v126_v35 }
  0x21   :  { %v145_v38 = vsel %vm129_vm1, %v127_v36, 0.0  ;;  %150 = vst [vmem:[#allocation7 + $0x40] sm:$0xff] %v144_v37 }
  0x22   :  { %151 = vst [vmem:[#allocation7 + $0x48] sm:$0xff] %v145_v38 }
  0x23   :  { %160 = vst [vmem:[#allocation7 + $0x58] sm:$0xff] %v127_v36 }
  0x24   :  { %173 = dma.vmem_to_hbm [thread:$0]  %s166_s1, 1536, %s168_s23, [#allocation4], %s274_s17, %s274_s17, %s275_s18  }
  0x25   :  { %271 = dma.done.wait [#allocation4], 1536  }
  0x26   :  { %272 = vsyncadd [#allocation4], 4294965760 }
  0x27   :  { %178 = vsyncpa [#allocation3], 1 }
  0x28   :  { %179 = vsyncpa [#allocation6], 1 }
  0x29   :  { %180 = vsyncpa [#allocation4], 1 }

</bundles_post_ra>
